<compile_context>
chip_gen: v6e
topology: v6e:2x2x1
jax: 0.10.0
libtpu: 0.0.40
codegen_flags: <defaults>
</compile_context>

<pallas_src>
import functools

import jax
import jax.numpy as jnp
from jax.experimental import pallas as pl
from jax.experimental.pallas import tpu as pltpu


def _round_up(x, m):
    return (x + m - 1) // m * m


def _bn_add_relu_conv_kernel(x_ref, r_ref, scale_ref, shift_ref, w_ref, o_ref):
    # x_ref, r_ref: (Cin, TM)   scale_ref, shift_ref: (Cin, 1)
    # w_ref: (TC, Cin)          o_ref: (TC, TM)
    a = x_ref[...] * scale_ref[...] + shift_ref[...] + r_ref[...]   # BN + residual add
    a = jnp.maximum(a, 0.0)                                          # ReLU
    # 1x1 conv == matmul on the MXU, f32 accumulation.
    o_ref[...] = jnp.dot(
        w_ref[...], a, preferred_element_type=jnp.float32
    ).astype(o_ref.dtype)


def fused_forward(x148, x135, gamma, beta, weight, *, eps=1e-5, stride=2,
                  tile_m=512, tile_cout=256):
    """conv1x1_s2( relu( x135 + batchnorm(x148) ) ), all tensors NCHW."""
    N, C, H, W = x148.shape
    Cout = weight.shape[0]
    Ho = (H - 1) // stride + 1
    Wo = (W - 1) // stride + 1
    M = N * Ho * Wo

    # --- Training-mode BatchNorm2d batch statistics (biased variance), one pass.
    xf = x148.astype(jnp.float32)
    cnt = N * H * W
    s1 = jnp.sum(xf, axis=(0, 2, 3))
    s2 = jnp.sum(xf * xf, axis=(0, 2, 3))
    mean = s1 / cnt
    var = s2 / cnt - mean * mean
    scale = gamma * jax.lax.rsqrt(var + eps)          # (C,)
    shift = beta - mean * scale                       # (C,)

    # --- Subsample (stride-2 positions only) and form the (C, M) matmul view.
    xs = x148[:, :, ::stride, ::stride]
    rs = x135[:, :, ::stride, ::stride]
    xs = jnp.transpose(xs, (1, 0, 2, 3)).reshape(C, M)   # free for N == 1
    rs = jnp.transpose(rs, (1, 0, 2, 3)).reshape(C, M)
    wmat = weight.reshape(Cout, C)

    # --- Tile sizes & padding (lane-dense output, ragged tiles handled by padding).
    TM = min(tile_m, _round_up(M, 128))          # lane tile, multiple of 128
    Mp = _round_up(M, TM)
    TC = min(tile_cout, _round_up(Cout, 8))      # Cout (sublane) tile, multiple of 8
    Coutp = _round_up(Cout, TC)

    if Mp != M:
        xs = jnp.pad(xs, ((0, 0), (0, Mp - M)))
        rs = jnp.pad(rs, ((0, 0), (0, Mp - M)))
    if Coutp != Cout:
        wmat = jnp.pad(wmat, ((0, Coutp - Cout), (0, 0)))

    scale2 = scale.reshape(C, 1)
    shift2 = shift.reshape(C, 1)

    grid = (Mp // TM, Coutp // TC)   # i: M tiles (outer), j: Cout tiles (inner)

    out_flat = pl.pallas_call(
        _bn_add_relu_conv_kernel,
        out_shape=jax.ShapeDtypeStruct((Coutp, Mp), x148.dtype),
        grid=grid,
        in_specs=[
            pl.BlockSpec((C, TM), lambda i, j: (0, i)),    # xs: resident over inner j
            pl.BlockSpec((C, TM), lambda i, j: (0, i)),    # rs: resident over inner j
            pl.BlockSpec((C, 1), lambda i, j: (0, 0)),     # scale
            pl.BlockSpec((C, 1), lambda i, j: (0, 0)),     # shift
            pl.BlockSpec((TC, C), lambda i, j: (j, 0)),    # weight: streams over j
        ],
        out_specs=pl.BlockSpec((TC, TM), lambda i, j: (j, i)),
        compiler_params=pltpu.CompilerParams(
            dimension_semantics=("parallel", "parallel"),
            vmem_limit_bytes=32 * 1024 * 1024,
        ),
    )(xs, rs, scale2, shift2, wmat)

    out = out_flat[:Cout, :M].reshape(Cout, N, Ho, Wo)
    return jnp.transpose(out, (1, 0, 2, 3))   # -> NCHW (free for N == 1)


def _reference(x148, x135, gamma, beta, weight, eps=1e-5, stride=2):
    mean = jnp.mean(x148, axis=(0, 2, 3), keepdims=True)
    var = jnp.var(x148, axis=(0, 2, 3), keepdims=True)
    xhat = (x148 - mean) * jax.lax.rsqrt(var + eps)
    y = xhat * gamma.reshape(1, -1, 1, 1) + beta.reshape(1, -1, 1, 1)
    y = jnp.maximum(x135 + y, 0.0)
    return jax.lax.conv_general_dilated(
        y, weight, window_strides=(stride, stride), padding="VALID",
        dimension_numbers=("NCHW", "OIHW", "NCHW"),
    )


if __name__ == "__main__":
    # Small shapes consistent with the module (NCHW, N=1, 1x1 stride-2 conv, no
    # bias).  Chosen so the tiled grid exercises multiple (ragged) tiles on both
    # the M axis (M=196 -> Mp=256, TM=128) and the Cout axis (200 -> 256, TC=128).
    N, Cin, H, W = 1, 96, 28, 28
    Cout = 200

    key = jax.random.PRNGKey(0)
    k1, k2, k3, k4, k5 = jax.random.split(key, 5)
    x148 = jax.random.normal(k1, (N, Cin, H, W), dtype=jnp.float32)
    x135 = jax.random.normal(k2, (N, Cin, H, W), dtype=jnp.float32)
    gamma = jax.random.normal(k3, (Cin,), dtype=jnp.float32) * 0.1 + 1.0
    beta = jax.random.normal(k4, (Cin,), dtype=jnp.float32) * 0.1
    weight = jax.random.normal(k5, (Cout, Cin, 1, 1), dtype=jnp.float32) * 0.05

    fused = jax.jit(functools.partial(fused_forward, tile_m=128, tile_cout=128))
    out = jax.block_until_ready(fused(x148, x135, gamma, beta, weight))
    ref = jax.block_until_ready(_reference(x148, x135, gamma, beta, weight))

    assert out.shape == (N, Cout, H // 2, W // 2), out.shape
    max_err = float(jnp.max(jnp.abs(out - ref)))
    assert jnp.allclose(out, ref, atol=1e-3, rtol=1e-3), max_err
    print("KERNEL_OK")
</pallas_src>

<mosaic_0001>
module attributes {stable_mosaic.version = 11 : i64} {
  func.func @_bn_add_relu_conv_kernel(%arg0: i32, %arg1: i32, %arg2: memref<96x128xf32, #tpu.memory_space<vmem>>, %arg3: memref<96x128xf32, #tpu.memory_space<vmem>>, %arg4: memref<96x1xf32, #tpu.memory_space<vmem>>, %arg5: memref<96x1xf32, #tpu.memory_space<vmem>>, %arg6: memref<128x96xf32, #tpu.memory_space<vmem>>, %arg7: memref<128x128xf32, #tpu.memory_space<vmem>>) attributes {dimension_semantics = [#tpu.dimension_semantics<parallel>, #tpu.dimension_semantics<parallel>], iteration_bounds = array<i64: 2, 2>, scalar_prefetch = 0 : i64, scratch_operands = 0 : i64, tpu.core_type = #tpu.core_type<tc>, window_params = [{transform_indices = @transform_0, window_bounds = array<i64: 96, 128>}, {transform_indices = @transform_1, window_bounds = array<i64: 96, 128>}, {pipeline_mode = #tpu.pipeline_mode<synchronous>, transform_indices = @transform_2, window_bounds = array<i64: 96, 1>}, {pipeline_mode = #tpu.pipeline_mode<synchronous>, transform_indices = @transform_3, window_bounds = array<i64: 96, 1>}, {transform_indices = @transform_4, window_bounds = array<i64: 128, 96>}, {transform_indices = @transform_5, window_bounds = array<i64: 128, 128>}]} {
    %c0 = arith.constant 0 : index
    %c0_0 = arith.constant 0 : index
    %0 = vector.load %arg2[%c0, %c0_0] : memref<96x128xf32, #tpu.memory_space<vmem>>, vector<96x128xf32>
    %c0_1 = arith.constant 0 : index
    %c0_2 = arith.constant 0 : index
    %1 = vector.load %arg4[%c0_1, %c0_2] : memref<96x1xf32, #tpu.memory_space<vmem>>, vector<96x1xf32>
    %2 = vector.broadcast %1 : vector<96x1xf32> to vector<96x128xf32>
    %3 = arith.mulf %0, %2 : vector<96x128xf32>
    %c0_3 = arith.constant 0 : index
    %c0_4 = arith.constant 0 : index
    %4 = vector.load %arg5[%c0_3, %c0_4] : memref<96x1xf32, #tpu.memory_space<vmem>>, vector<96x1xf32>
    %5 = vector.broadcast %4 : vector<96x1xf32> to vector<96x128xf32>
    %6 = arith.addf %3, %5 : vector<96x128xf32>
    %c0_5 = arith.constant 0 : index
    %c0_6 = arith.constant 0 : index
    %7 = vector.load %arg3[%c0_5, %c0_6] : memref<96x128xf32, #tpu.memory_space<vmem>>, vector<96x128xf32>
    %8 = arith.addf %6, %7 : vector<96x128xf32>
    %cst = arith.constant 0.000000e+00 : f32
    %9 = vector.broadcast %cst : f32 to vector<96x128xf32>
    %10 = arith.maximumf %8, %9 : vector<96x128xf32>
    %c0_7 = arith.constant 0 : index
    %c0_8 = arith.constant 0 : index
    %11 = vector.load %arg6[%c0_7, %c0_8] : memref<128x96xf32, #tpu.memory_space<vmem>>, vector<128x96xf32>
    %cst_9 = arith.constant dense<0.000000e+00> : vector<128x128xf32>
    %12 = tpu.matmul %11, %10, %cst_9 {dimension_numbers = #tpu.dot_dimension_numbers<[1], [0], [0], [1], [0, 0, 1, 1], [], []>} : vector<128x96xf32>, vector<96x128xf32>, vector<128x128xf32> -> vector<128x128xf32>
    %c0_10 = arith.constant 0 : index
    %c0_11 = arith.constant 0 : index
    %13 = vector.load %arg7[%c0_10, %c0_11] : memref<128x128xf32, #tpu.memory_space<vmem>>, vector<128x128xf32>
    tpu.vector_store %arg7[%c0_10, %c0_11], %12 {strides = array<i32>} : memref<128x128xf32, #tpu.memory_space<vmem>>, vector<128x128xf32>,
    return
  }
  func.func @transform_0(%arg0: i32, %arg1: i32) -> (i32, i32) {
    %c0_i32 = arith.constant 0 : i32
    %c0_i32_0 = arith.constant 0 : i32
    return %c0_i32, %arg0 : i32, i32
  }
  func.func @transform_1(%arg0: i32, %arg1: i32) -> (i32, i32) {
    %c0_i32 = arith.constant 0 : i32
    %c0_i32_0 = arith.constant 0 : i32
    return %c0_i32, %arg0 : i32, i32
  }
  func.func @transform_2(%arg0: i32, %arg1: i32) -> (i32, i32) {
    %c0_i32 = arith.constant 0 : i32
    %c0_i32_0 = arith.constant 0 : i32
    %c0_i32_1 = arith.constant 0 : i32
    return %c0_i32, %c0_i32_0 : i32, i32
  }
  func.func @transform_3(%arg0: i32, %arg1: i32) -> (i32, i32) {
    %c0_i32 = arith.constant 0 : i32
    %c0_i32_0 = arith.constant 0 : i32
    %c0_i32_1 = arith.constant 0 : i32
    return %c0_i32, %c0_i32_0 : i32, i32
  }
  func.func @transform_4(%arg0: i32, %arg1: i32) -> (i32, i32) {
    %c0_i32 = arith.constant 0 : i32
    %c0_i32_0 = arith.constant 0 : i32
    return %arg1, %c0_i32 : i32, i32
  }
  func.func @transform_5(%arg0: i32, %arg1: i32) -> (i32, i32) {
    %c0_i32 = arith.constant 0 : i32
    return %arg1, %arg0 : i32, i32
  }
}

</mosaic_0001>

<bundles_post_ra>
// kernel: fused_forward.1
= control target key start
LH: loop header
LB: loop body
LE: loop exit
PB: predicated region body
PF: predicated region fallthrough
CT: control target
= control target key end

     0   :  { %s1395_s18 = smov 0   ;;  %s1397_s19 = smov 0   ;;  %s1698_s0 = inlined_call_operand.vmem [shape: f32[96,256], index: 0, kind: input, shape index: {}]   ;;  %s1699_s1 = inlined_call_operand.vmem [shape: f32[96,256], index: 1, kind: input, shape index: {}]   ;;  %s1700_s2 = inlined_call_operand.vmem [shape: f32[96,1], index: 2, kind: input, shape index: {}]   ;;  %s1701_s3 = inlined_call_operand.vmem [shape: f32[96,1], index: 3, kind: input, shape index: {}]   ;;  %s1702_s4 = inlined_call_operand.vmem [shape: f32[256,96], index: 4, kind: input, shape index: {}]   ;;  %s1703_s5 = inlined_call_operand.vmem [shape: f32[256,256], index: 5, kind: output, shape index: {}]  }
   0x1   :  { %s1399_s20 = smov 0   ;;  %s1401_s21 = smov 0  }
   0x2   :  { %s1403_s22 = smov 0   ;;  %s1405_s23 = smov 0  }
   0x3   :  { %s1407_s24 = smov 0   ;;  %s1409_s25 = smov 0  }
   0x4   :  { %s1411_s26 = smov 0  }
   0x5 LB: > { %s24_s27 = sadd.s32 1, %s1354_s24  ;;  %s27_s28 = sadd.s32 1, %s1358_s25  ;;  %s1362_s26 = sphi %s1411_s26, %s15_s26   ;;  %s1358_s25 = sphi %s1409_s25, %s1713_s25   ;;  %s1354_s24 = sphi %s1407_s24, %s1712_s24   ;;  %s1350_s23 = sphi %s1405_s23, %s1711_s23   ;;  %s1346_s22 = sphi %s1403_s22, %s1710_s22   ;;  %s1342_s21 = sphi %s1401_s21, %s1709_s21   ;;  %s1338_s20 = sphi %s1399_s20, %s1708_s20   ;;  %s1334_s19 = sphi %s1397_s19, %s1707_s19   ;;  %s1330_s18 = sphi %s1395_s18, %s1706_s18  }
   0x6   : > { %p25_p0 = scmp.ge.s32.totalorder %s24_s27, 2  ;;  %p41_p1 = scmp.ne.s32.totalorder %s1342_s21, %s1338_s20 }
   0x7   : > { %s1081_s29 = sadd.s32 4294967295, %s1362_s26   ;;  %p42_p2 = scmp.eq.s32.totalorder %s1362_s26, 0 }
   0x8   : > { %s1715_s27 = smov (%p25_p0, %s24_s27), 0  ;;  %s1717_s28 = smov (!%p25_p0, %s27_s28), %s1358_s25 }
   0x9   : > { %p29_p3 = scmp.ge.s32.totalorder %s1717_s28, 2  ;;  %s151_s30 = ssub.s32 %s1354_s24, %s1715_s27 }
   0xa   : > { %p1451_p4 = por %p42_p2, %p41_p1  ;;  %p166_p5 = scmp.ne.s32.totalorder %s1334_s19, %s1330_s18 }
   0xb   : > { %s1719_s28 = smov (%p29_p3, %s1717_s28), 0  ;;  %s34_s7 = sadd.s32 1, %s1342_s21 }
   0xc   : > { %p167_p6 = scmp.eq.s32.totalorder %s1081_s29, 3  ;;  %s31_s8 = ssub.s32 %s1358_s25, %s1719_s28 }
   0xd   : > { %s156_s9 = sadd.s32 1, %s1334_s19  ;;  %p32_p7 = scmp.eq.s32.totalorder %s31_s8, 0 }
   0xe   : > { %s153_s10 = sor.u32 %s151_s30, %s31_s8  ;;  %p1463_p9 = por %p167_p6, %p166_p5 }
   0xf   : > { %p154_p8 = scmp.eq.s32.totalorder %s153_s10, 0  ;;  %p1084_p10 = scmp.ge.s32.totalorder %s1362_s26, 4 }
  0x10   : > { %s1468_s12 = scalar_select %p32_p7, %s1342_s21, %s34_s7  }
  0x11   : > { %s1471_s13 = scalar_select %p154_p8, %s1334_s19, %s156_s9  }
  0x12   : > { %195 = sbr.rel (%p1084_p10) target bundleno = 43 (0x2b), region = 24 }
  0x17   : > { %198 = sbr.rel (!%p1451_p4) target bundleno = 33 (0x21), region = 28  ;;  %s200_s14 = sand.u32 (%p1451_p4), 1, %s1342_s21  }
  0x18   : > { %s1085_s15 = sshll.u32 (%p1451_p4), %s1358_s25, 3  ;;  %s1214_s16 = smul.u32 (%p1451_p4), 96, %s200_s14 }
  0x19   : > { %s204_s30 = scalar_lea.vmem (%p1451_p4), %s1698_s0, %s1085_s15 }
  0x1a   : > { %v255_v0 = vld [vmem:[%s204_s30] sm:$0xff] (%p1451_p4)  ;;  %v257_v1 = vld [vmem:[%s204_s30 + $0x10] sm:$0xff] (%p1451_p4)  ;;  %s202_s7 = scalar_lea.vmem (%p1451_p4), [#allocation2], %s1214_s16 }
  0x1b   : > { %v259_v2 = vld [vmem:[%s204_s30 + $0x20] sm:$0xff] (%p1451_p4)  ;;  %v261_v3 = vld [vmem:[%s204_s30 + $0x30] sm:$0xff] (%p1451_p4)  ;;  %256 = vst [vmem:[%s202_s7] sm:$0xff] (%p1451_p4), %v255_v0  ;;  %258 = vst [vmem:[%s202_s7 + $0x8] sm:$0xff] (%p1451_p4), %v257_v1 }
  0x1c   : > { %v263_v4 = vld [vmem:[%s204_s30 + $0x40] sm:$0xff]  ;;  %v265_v5 = vld [vmem:[%s204_s30 + $0x50] sm:$0xff]  ;;  %260 = vst [vmem:[%s202_s7 + $0x10] sm:$0xff] %v259_v2  ;;  %262 = vst [vmem:[%s202_s7 + $0x18] sm:$0xff] %v261_v3 }
  0x1d   : > { %264 = vst [vmem:[%s202_s7 + $0x20] sm:$0xff] %v263_v4  ;;  %266 = vst [vmem:[%s202_s7 + $0x28] sm:$0xff] %v265_v5  ;;  %v267_v6 = vld [vmem:[%s204_s30 + $0x60] sm:$0xff]  ;;  %v269_v7 = vld [vmem:[%s204_s30 + $0x70] sm:$0xff] }
  0x1e   : > { %v271_v8 = vld [vmem:[%s204_s30 + $0x80] sm:$0xff]  ;;  %268 = vst [vmem:[%s202_s7 + $0x30] sm:$0xff] %v267_v6  ;;  %270 = vst [vmem:[%s202_s7 + $0x38] sm:$0xff] %v269_v7  ;;  %v273_v9 = vld [vmem:[%s204_s30 + $0x90] sm:$0xff] }
  0x1f   : > { %272 = vst [vmem:[%s202_s7 + $0x40] sm:$0xff] %v271_v8  ;;  %v275_v10 = vld [vmem:[%s204_s30 + $0xa0] sm:$0xff]  ;;  %v277_v11 = vld [vmem:[%s204_s30 + $0xb0] sm:$0xff]  ;;  %274 = vst [vmem:[%s202_s7 + $0x48] sm:$0xff] %v273_v9 }
  0x20   : > { %276 = vst [vmem:[%s202_s7 + $0x50] sm:$0xff] %v275_v10  ;;  %278 = vst [vmem:[%s202_s7 + $0x58] sm:$0xff] %v277_v11 }
  0x21 PF: > { %284 = sbr.rel (!%p1451_p4) target bundleno = 43 (0x2b), region = 66  ;;  %s286_s8 = sand.u32 (%p1451_p4), 1, %s1342_s21  }
  0x22   : > { %s1086_s9 = sshll.u32 (%p1451_p4), %s1358_s25, 3  ;;  %s1215_s10 = smul.u32 (%p1451_p4), 96, %s286_s8 }
  0x23   : > { %s290_s16 = scalar_lea.vmem (%p1451_p4), %s1699_s1, %s1086_s9 }
  0x24   : > { %v341_v12 = vld [vmem:[%s290_s16] sm:$0xff] (%p1451_p4)  ;;  %v343_v13 = vld [vmem:[%s290_s16 + $0x10] sm:$0xff] (%p1451_p4)  ;;  %s288_s17 = scalar_lea.vmem (%p1451_p4), [#allocation3], %s1215_s10 }
  0x25   : > { %v345_v14 = vld [vmem:[%s290_s16 + $0x20] sm:$0xff] (%p1451_p4)  ;;  %v347_v15 = vld [vmem:[%s290_s16 + $0x30] sm:$0xff] (%p1451_p4)  ;;  %342 = vst [vmem:[%s288_s17] sm:$0xff] (%p1451_p4), %v341_v12  ;;  %344 = vst [vmem:[%s288_s17 + $0x8] sm:$0xff] (%p1451_p4), %v343_v13 }
  0x26   : > { %v349_v16 = vld [vmem:[%s290_s16 + $0x40] sm:$0xff]  ;;  %v351_v17 = vld [vmem:[%s290_s16 + $0x50] sm:$0xff]  ;;  %346 = vst [vmem:[%s288_s17 + $0x10] sm:$0xff] %v345_v14  ;;  %348 = vst [vmem:[%s288_s17 + $0x18] sm:$0xff] %v347_v15 }
  0x27   : > { %350 = vst [vmem:[%s288_s17 + $0x20] sm:$0xff] %v349_v16  ;;  %352 = vst [vmem:[%s288_s17 + $0x28] sm:$0xff] %v351_v17  ;;  %v353_v18 = vld [vmem:[%s290_s16 + $0x60] sm:$0xff]  ;;  %v355_v19 = vld [vmem:[%s290_s16 + $0x70] sm:$0xff] }
  0x28   : > { %v357_v20 = vld [vmem:[%s290_s16 + $0x80] sm:$0xff]  ;;  %354 = vst [vmem:[%s288_s17 + $0x30] sm:$0xff] %v353_v18  ;;  %356 = vst [vmem:[%s288_s17 + $0x38] sm:$0xff] %v355_v19  ;;  %v359_v21 = vld [vmem:[%s290_s16 + $0x90] sm:$0xff] }
  0x29   : > { %358 = vst [vmem:[%s288_s17 + $0x40] sm:$0xff] %v357_v20  ;;  %v361_v22 = vld [vmem:[%s290_s16 + $0xa0] sm:$0xff]  ;;  %v363_v23 = vld [vmem:[%s290_s16 + $0xb0] sm:$0xff]  ;;  %360 = vst [vmem:[%s288_s17 + $0x48] sm:$0xff] %v359_v21 }
  0x2a   : > { %362 = vst [vmem:[%s288_s17 + $0x50] sm:$0xff] %v361_v22  ;;  %364 = vst [vmem:[%s288_s17 + $0x58] sm:$0xff] %v363_v23 }
  0x2b PF: > { %p1087_p11 = scmp.ge.s32.totalorder %s1362_s26, 1  ;;  %p378_p12 = scmp.lt.s32.totalorder %s1362_s26, 5 }
  0x2d   : > { %p379_p13 = pnand %p1087_p11, %p378_p12 }
  0x2e   : > { %s1089_s8 = sshll.u32 (!%p379_p13), %s1346_s22, 4  ;;  %s385_s16 = sand.u32 (!%p379_p13), 1, %s1338_s20  }
  0x2f   : > { %382 = sbr.rel (%p379_p13) target bundleno = 449 (0x1c1), region = 108  ;;  %p428_p0 = scmp.lt.s32.totalorder (!%p379_p13), %s1089_s8, 31 }
  0x30   : > { %s1216_s17 = smul.u32 (!%p379_p13), 96, %s385_s16  ;;  %s424_s20 = sand.u32 (!%p379_p13), 1, %s1330_s18  }
  0x31   : > { %s1088_s30 = sshll.u32 (!%p379_p13), %s424_s20, 7 }
  0x32   : > { %s1573_s6 = scalar_lea.vmem (!%p379_p13), [#allocation2], %s1216_s17  ;;  %s1576_s29 = scalar_lea.vmem (!%p379_p13), [#allocation3], %s1216_s17 }
  0x33   : > { %s1630_s7 = scalar_lea.vmem (!%p379_p13), [#allocation4], %s1088_s30 }
  0x34   : > { %v541_v24 = vld [vmem:[%s1701_s3 + $0x58] sm:$0xff]  ;;  %v1364_v26 = vmov 0   ;;  %v456_v27 = vld [vmem:[%s1700_s2 + $0x50] sm:$0xff]  ;;  %v455_v28 = vld [vmem:[%s1700_s2 + $0x48] sm:$0xff]  ;;  %s1721_s8 = smov (!%p428_p0, %s1089_s8), 31  ;;  %vm666_vm0 = vcmask 785408  }
  0x35   : > { %v457_v25 = vld [vmem:[%s1700_s2 + $0x58] sm:$0xff]  ;;  %1291 = vset.pattern.permute.xlu1 %v1364_v26  ;;  %1290 = vset.pattern.permute.xlu0 %v1364_v26  ;;  %v540_v29 = vld [vmem:[%s1701_s3 + $0x50] sm:$0xff]  ;;  %v454_v30 = vld [vmem:[%s1700_s2 + $0x40] sm:$0xff]  ;;  %s1090_s9 = sshll.u32 %s1721_s8, 3  ;;  %s1113_s18 = sshll.u32 (%p1463_p9), %s1346_s22, 5 }
  0x36   : > { %599 = vperm.xlu1 %1291, %v541_v24   ;;  %515 = vperm.xlu0 %1290, %v457_v25   ;;  %v539_v31 = vld [vmem:[%s1701_s3 + $0x48] sm:$0xff]  ;;  %v453_v32 = vld [vmem:[%s1700_s2 + $0x38] sm:$0xff]  ;;  %v538_v33 = vld [vmem:[%s1701_s3 + $0x40] sm:$0xff]  ;;  %s1566_s15 = scalar_lea.vmem %s1702_s4, %s1090_s9  ;;  %s885_s11 = sadd.s32 (%p1463_p9), %s1350_s23, %s1113_s18 }
  0x37   : > { %v452_v34 = vld [vmem:[%s1700_s2 + $0x30] sm:$0xff]  ;;  %v537_v35 = vld [vmem:[%s1701_s3 + $0x38] sm:$0xff]  ;;  %v451_v36 = vld [vmem:[%s1700_s2 + $0x28] sm:$0xff]  ;;  %s1110_s8 = sshll.u32 (%p1463_p9), %s885_s11, 3 }
  0x38   : > { %v536_v37 = vld [vmem:[%s1701_s3 + $0x30] sm:$0xff]  ;;  %v450_v38 = vld [vmem:[%s1700_s2 + $0x20] sm:$0xff]  ;;  %v535_v39 = vld [vmem:[%s1701_s3 + $0x28] sm:$0xff]  ;;  %s887_s14 = scalar_lea.vmem (%p1463_p9), %s1703_s5, %s1110_s8 }
  0x39   : > { %v449_v40 = vld [vmem:[%s1700_s2 + $0x18] sm:$0xff]  ;;  %v534_v41 = vld [vmem:[%s1701_s3 + $0x20] sm:$0xff]  ;;  %v448_v42 = vld [vmem:[%s1700_s2 + $0x10] sm:$0xff] }
  0x3a   : > { %510 = vperm.xlu0 %1290, %v456_v27   ;;  %505 = vperm.xlu1 %1291, %v455_v28   ;;  %v533_v43 = vld [vmem:[%s1701_s3 + $0x18] sm:$0xff]  ;;  %v447_v44 = vld [vmem:[%s1700_s2 + $0x8] sm:$0xff]  ;;  %v532_v45 = vld [vmem:[%s1701_s3 + $0x10] sm:$0xff] }
  0x3b   : > { %v446_v46 = vld [vmem:[%s1700_s2] sm:$0xff]  ;;  %v531_v47 = vld [vmem:[%s1701_s3 + $0x8] sm:$0xff]  ;;  %v445_v51 = vld [vmem:[%s1573_s6 + $0x58] sm:$0xff] }
  0x3c   : > { %v530_v48 = vld [vmem:[%s1701_s3] sm:$0xff]  ;;  %v625_v55 = vld [vmem:[%s1576_s29 + $0x58] sm:$0xff]  ;;  %v444_v58 = vld [vmem:[%s1573_s6 + $0x50] sm:$0xff] }
  0x3d   : > { %v650_v49 = vld [vmem:[%s1566_s15] sm:$0xff]  ;;  %v443_v63 = vld [vmem:[%s1573_s6 + $0x48] sm:$0xff]  ;;  %v624_v1 = vld [vmem:[%s1576_s29 + $0x50] sm:$0xff] }
  0x3e   : > { %594 = vperm.xlu0 %1290, %v540_v29   ;;  %500 = vperm.xlu1 %1291, %v454_v30   ;;  %v658_v50 = vld [vmem:[%s1566_s15 + $0x40] sm:$0xff]  ;;  %v623_v8 = vld [vmem:[%s1576_s29 + $0x48] sm:$0xff]  ;;  %v441_v14 = vld [vmem:[%s1573_s6 + $0x38] sm:$0xff] }
  0x3f   : > { %1166 = vmatprep.mubr.msk.f32.mxu0 %vm666_vm0, %v650_v49  ;;  %1178 = vmatprep.mubr.msk.f32.mxu1 %vm666_vm0, %v658_v50  ;;  %v442_v6 = vld [vmem:[%s1573_s6 + $0x40] sm:$0xff]  ;;  %v440_v22 = vld [vmem:[%s1573_s6 + $0x30] sm:$0xff]  ;;  %v621_v24 = vld [vmem:[%s1576_s29 + $0x38] sm:$0xff] }
  0x40   : > { %v622_v16 = vld [vmem:[%s1576_s29 + $0x40] sm:$0xff]  ;;  %v439_v30 = vld [vmem:[%s1573_s6 + $0x28] sm:$0xff] }
  0x42   : > { %589 = vperm.xlu0 %1290, %v539_v31   ;;  %495 = vperm.xlu1 %1291, %v453_v32   ;;  %v620_v32 = vld [vmem:[%s1576_s29 + $0x30] sm:$0xff] }
  0x46   : > { %584 = vperm.xlu0 %1290, %v538_v33   ;;  %490 = vperm.xlu1 %1291, %v452_v34  }
  0x4a   : > { %579 = vperm.xlu0 %1290, %v537_v35   ;;  %485 = vperm.xlu1 %1291, %v451_v36  }
  0x4e   : > { %574 = vperm.xlu0 %1290, %v536_v37   ;;  %480 = vperm.xlu1 %1291, %v450_v38   ;;  %v438_v38 = vld [vmem:[%s1573_s6 + $0x20] sm:$0xff] }
  0x52   : > { %569 = vperm.xlu0 %1290, %v535_v39   ;;  %475 = vperm.xlu1 %1291, %v449_v40   ;;  %v619_v40 = vld [vmem:[%s1576_s29 + $0x28] sm:$0xff] }
  0x56   : > { %564 = vperm.xlu0 %1290, %v534_v41   ;;  %470 = vperm.xlu1 %1291, %v448_v42  }
  0x5a   : > { %559 = vperm.xlu0 %1290, %v533_v43   ;;  %465 = vperm.xlu1 %1291, %v447_v44  }
  0x5e   : > { %554 = vperm.xlu0 %1290, %v532_v45   ;;  %460 = vperm.xlu1 %1291, %v446_v46   ;;  %v437_v46 = vld [vmem:[%s1573_s6 + $0x18] sm:$0xff] }
  0x62   : > { %549 = vperm.xlu0 %1290, %v531_v47   ;;  %544 = vperm.xlu1 %1291, %v530_v48   ;;  %v618_v48 = vld [vmem:[%s1576_s29 + $0x20] sm:$0xff] }
  0xb1   : > { %v600_v52 = vpop.permute.xlu1 %599  ;;  %v516_v53 = vpop.permute.xlu0 %515 }
  0xb2   : > { %v529_v54 = vmul.f32 %v516_v53, %v445_v51 }
  0xb4   : > { %v613_v56 = vadd.f32 %v600_v52, %v529_v54  ;;  %v436_v54 = vld [vmem:[%s1573_s6 + $0x10] sm:$0xff] }
  0xb5   : > { %v511_v57 = vpop.permute.xlu0 %510  ;;  %v506_v59 = vpop.permute.xlu1 %505 }
  0xb6   : > { %v637_v60 = vadd.f32 %v625_v55, %v613_v56  ;;  %v528_v62 = vmul.f32 %v511_v57, %v444_v58  ;;  %v527_v4 = vmul.f32 %v506_v59, %v443_v63  ;;  %v617_v56 = vld [vmem:[%s1576_s29 + $0x18] sm:$0xff] }
  0xb8   : > { %v649_v61 = vmax.f32 %v637_v60, 0.0 }
  0xb9   : > { %v595_v0 = vpop.permute.xlu0 %594  ;;  %v501_v2 = vpop.permute.xlu1 %500 }
  0xba   : > { %v612_v3 = vadd.f32 %v595_v0, %v528_v62  ;;  %1142 = vmatprep.subr.mxu0 %v649_v61  ;;  %1190 = vmatprep.subr.mxu1 %v649_v61  ;;  %v526_v12 = vmul.f32 %v501_v2, %v442_v6  ;;  %v435_v62 = vld [vmem:[%s1573_s6 + $0x8] sm:$0xff]  ;;  %v616_v0 = vld [vmem:[%s1576_s29 + $0x10] sm:$0xff]  ;;  %v434_v2 = vld [vmem:[%s1573_s6] sm:$0xff] }
  0xbb   : > { %1143 = vmatpush3.msra.mxu0 %v649_v61  ;;  %1202 = vmatpush3.msra.mxu1 %v649_v61 }
  0xbc   : > { %v636_v5 = vadd.f32 %v624_v1, %v612_v3 }
  0xbd   : > { %v590_v7 = vpop.permute.xlu0 %589  ;;  %v496_v9 = vpop.permute.xlu1 %495 }
  0xbe   : > { %v648_v10 = vmax.f32 %v636_v5, 0.0  ;;  %v611_v11 = vadd.f32 %v590_v7, %v527_v4  ;;  %v525_v20 = vmul.f32 %v496_v9, %v441_v14  ;;  %v615_v9 = vld [vmem:[%s1576_s29 + $0x8] sm:$0xff] }
  0xc0   : > { %v635_v13 = vadd.f32 %v623_v8, %v611_v11  ;;  %1144 = vmatprep.subr.mxu0 %v648_v10  ;;  %1191 = vmatprep.subr.mxu1 %v648_v10  ;;  %v614_v11 = vld [vmem:[%s1576_s29] sm:$0xff] }
  0xc1   : > { %v585_v15 = vpop.permute.xlu0 %584  ;;  %v491_v17 = vpop.permute.xlu1 %490  ;;  %1145 = vmatpush3.msra.mxu0 %v648_v10  ;;  %1203 = vmatpush3.msra.mxu1 %v648_v10 }
  0xc2   : > { %v647_v18 = vmax.f32 %v635_v13, 0.0  ;;  %v610_v19 = vadd.f32 %v585_v15, %v526_v12  ;;  %v524_v28 = vmul.f32 %v491_v17, %v440_v22  ;;  %v660_v22 = vld [vmem:[%s1566_s15 + $0x50] sm:$0xff] }
  0xc4   : > { %v634_v21 = vadd.f32 %v622_v16, %v610_v19  ;;  %1146 = vmatprep.subr.mxu0 %v647_v18  ;;  %1192 = vmatprep.subr.mxu1 %v647_v18  ;;  %v651_v19 = vld [vmem:[%s1566_s15 + $0x8] sm:$0xff] }
  0xc5   : > { %v580_v23 = vpop.permute.xlu0 %579  ;;  %v486_v25 = vpop.permute.xlu1 %485  ;;  %1147 = vmatpush3.msra.mxu0 %v647_v18  ;;  %1204 = vmatpush3.msra.mxu1 %v647_v18 }
  0xc6   : > { %v646_v26 = vmax.f32 %v634_v21, 0.0  ;;  %v609_v27 = vadd.f32 %v580_v23, %v525_v20  ;;  %v523_v36 = vmul.f32 %v486_v25, %v439_v30  ;;  %v659_v20 = vld [vmem:[%s1566_s15 + $0x48] sm:$0xff]  ;;  %v652_v21 = vld [vmem:[%s1566_s15 + $0x10] sm:$0xff]  ;;  %v653_v23 = vld [vmem:[%s1566_s15 + $0x18] sm:$0xff] }
  0xc7   : > { %v654_v25 = vld [vmem:[%s1566_s15 + $0x20] sm:$0xff]  ;;  %v664_v30 = vld [vmem:[%s1566_s15 + $0x70] sm:$0xff] }
  0xc8   : > { %v633_v29 = vadd.f32 %v621_v24, %v609_v27  ;;  %1148 = vmatprep.subr.mxu0 %v646_v26  ;;  %1193 = vmatprep.subr.mxu1 %v646_v26  ;;  %v661_v24 = vld [vmem:[%s1566_s15 + $0x58] sm:$0xff]  ;;  %v655_v27 = vld [vmem:[%s1566_s15 + $0x28] sm:$0xff] }
  0xc9   : > { %v575_v31 = vpop.permute.xlu0 %574  ;;  %v481_v33 = vpop.permute.xlu1 %480  ;;  %1149 = vmatpush3.msra.mxu0 %v646_v26  ;;  %1205 = vmatpush3.msra.mxu1 %v646_v26  ;;  %v662_v26 = vld [vmem:[%s1566_s15 + $0x60] sm:$0xff] }
  0xca   : > { %v645_v34 = vmax.f32 %v633_v29, 0.0  ;;  %v608_v35 = vadd.f32 %v575_v31, %v524_v28  ;;  %v522_v44 = vmul.f32 %v481_v33, %v438_v38  ;;  %v663_v28 = vld [vmem:[%s1566_s15 + $0x68] sm:$0xff]  ;;  %v656_v29 = vld [vmem:[%s1566_s15 + $0x30] sm:$0xff]  ;;  %v657_v31 = vld [vmem:[%s1566_s15 + $0x38] sm:$0xff] }
  0xcc   : > { %v632_v37 = vadd.f32 %v620_v32, %v608_v35  ;;  %1150 = vmatprep.subr.mxu0 %v645_v34  ;;  %1194 = vmatprep.subr.mxu1 %v645_v34  ;;  %v665_v32 = vld [vmem:[%s1566_s15 + $0x78] sm:$0xff] }
  0xcd   : > { %v570_v39 = vpop.permute.xlu0 %569  ;;  %v476_v41 = vpop.permute.xlu1 %475  ;;  %1151 = vmatpush3.msra.mxu0 %v645_v34  ;;  %1206 = vmatpush3.msra.mxu1 %v645_v34 }
  0xce   : > { %v644_v42 = vmax.f32 %v632_v37, 0.0  ;;  %v607_v43 = vadd.f32 %v570_v39, %v523_v36  ;;  %v521_v52 = vmul.f32 %v476_v41, %v437_v46 }
  0xd0   : > { %v631_v45 = vadd.f32 %v619_v40, %v607_v43  ;;  %1152 = vmatprep.subr.mxu0 %v644_v42  ;;  %1195 = vmatprep.subr.mxu1 %v644_v42 }
  0xd1   : > { %v565_v47 = vpop.permute.xlu0 %564  ;;  %v471_v49 = vpop.permute.xlu1 %470  ;;  %1153 = vmatpush3.msra.mxu0 %v644_v42  ;;  %1207 = vmatpush3.msra.mxu1 %v644_v42 }
  0xd2   : > { %v643_v50 = vmax.f32 %v631_v45, 0.0  ;;  %v606_v51 = vadd.f32 %v565_v47, %v522_v44  ;;  %v520_v60 = vmul.f32 %v471_v49, %v436_v54 }
  0xd4   : > { %v630_v53 = vadd.f32 %v618_v48, %v606_v51  ;;  %1154 = vmatprep.subr.mxu0 %v643_v50  ;;  %1196 = vmatprep.subr.mxu1 %v643_v50 }
  0xd5   : > { %v560_v55 = vpop.permute.xlu0 %559  ;;  %v466_v57 = vpop.permute.xlu1 %465  ;;  %1155 = vmatpush3.msra.mxu0 %v643_v50  ;;  %1208 = vmatpush3.msra.mxu1 %v643_v50 }
  0xd6   : > { %v642_v58 = vmax.f32 %v630_v53, 0.0  ;;  %v605_v59 = vadd.f32 %v560_v55, %v521_v52  ;;  %v519_v5 = vmul.f32 %v466_v57, %v435_v62 }
  0xd8   : > { %v629_v61 = vadd.f32 %v617_v56, %v605_v59  ;;  %1156 = vmatprep.subr.mxu0 %v642_v58  ;;  %1197 = vmatprep.subr.mxu1 %v642_v58 }
  0xd9   : > { %v555_v63 = vpop.permute.xlu0 %554  ;;  %v461_v1 = vpop.permute.xlu1 %460  ;;  %1157 = vmatpush3.msra.mxu0 %v642_v58  ;;  %1209 = vmatpush3.msra.mxu1 %v642_v58 }
  0xda   : > { %v641_v3 = vmax.f32 %v629_v61, 0.0  ;;  %v604_v4 = vadd.f32 %v555_v63, %v520_v60  ;;  %v518_v7 = vmul.f32 %v461_v1, %v434_v2 }
  0xdc   : > { %v628_v6 = vadd.f32 %v616_v0, %v604_v4  ;;  %1158 = vmatprep.subr.mxu0 %v641_v3  ;;  %1198 = vmatprep.subr.mxu1 %v641_v3 }
  0xdd   : > { %v550_v8 = vpop.permute.xlu0 %549  ;;  %v545_v10 = vpop.permute.xlu1 %544  ;;  %1159 = vmatpush3.msra.mxu0 %v641_v3  ;;  %1210 = vmatpush3.msra.mxu1 %v641_v3 }
  0xde   : > { %v640_v12 = vmax.f32 %v628_v6, 0.0  ;;  %v603_v13 = vadd.f32 %v550_v8, %v519_v5  ;;  %v602_v14 = vadd.f32 %v545_v10, %v518_v7 }
  0xe0   : > { %v627_v15 = vadd.f32 %v615_v9, %v603_v13  ;;  %v626_v16 = vadd.f32 %v614_v11, %v602_v14  ;;  %1160 = vmatprep.subr.mxu0 %v640_v12  ;;  %1199 = vmatprep.subr.mxu1 %v640_v12 }
  0xe1   : > { %1161 = vmatpush3.msra.mxu0 %v640_v12  ;;  %1211 = vmatpush3.msra.mxu1 %v640_v12 }
  0xe2   : > { %v639_v17 = vmax.f32 %v627_v15, 0.0  ;;  %v638_v18 = vmax.f32 %v626_v16, 0.0 }
  0xe4   : > { %1162 = vmatprep.subr.mxu0 %v639_v17  ;;  %1200 = vmatprep.subr.mxu1 %v639_v17 }
  0xe5   : > { %1163 = vmatpush3.msra.mxu0 %v639_v17  ;;  %1212 = vmatpush3.msra.mxu1 %v639_v17 }
  0xe6   : > { %1164 = vmatprep.subr.mxu0 %v638_v18  ;;  %1201 = vmatprep.subr.mxu1 %v638_v18 }
  0xe7   : > { %1165 = vmatpush3.msra.mxu0 %v638_v18  ;;  %1213 = vmatpush3.msra.mxu1 %v638_v18 }
  0xe8   : > { %1167 = vmatmul.mubr.msk.f32.vlgmr.msra.gmra.mxu0 %vm666_vm0, %v651_v19  ;;  %1179 = vmatmul.mubr.msk.f32.vlgmr.msra.gmra.mxu1 %vm666_vm0, %v659_v20 }
  0xe9   : > { %1169 = vmatprep.mubr.msk.f32.mxu0 %vm666_vm0, %v652_v21  ;;  %1181 = vmatprep.mubr.msk.f32.mxu1 %vm666_vm0, %v660_v22 }
  0xec   : > { %1170 = vmatmul.mubr.msk.f32.gmra.mxu0 %vm666_vm0, %v653_v23  ;;  %1182 = vmatmul.mubr.msk.f32.gmra.mxu1 %vm666_vm0, %v661_v24 }
  0xed   : > { %1172 = vmatprep.mubr.msk.f32.mxu0 %vm666_vm0, %v654_v25  ;;  %1184 = vmatprep.mubr.msk.f32.mxu1 %vm666_vm0, %v662_v26 }
  0xf0   : > { %1173 = vmatmul.mubr.msk.f32.gmra.mxu0 %vm666_vm0, %v655_v27  ;;  %1185 = vmatmul.mubr.msk.f32.gmra.mxu1 %vm666_vm0, %v663_v28 }
  0xf1   : > { %1175 = vmatprep.mubr.msk.f32.mxu0 %vm666_vm0, %v656_v29  ;;  %1187 = vmatprep.mubr.msk.f32.mxu1 %vm666_vm0, %v664_v30 }
  0xf4   : > { %1176 = vmatmul.mubr.msk.f32.gmra.mxu0 %vm666_vm0, %v657_v31  ;;  %1188 = vmatmul.mubr.msk.f32.gmra.mxu1 %vm666_vm0, %v665_v32 }
 0x1a8   : > { %v1168_v33 = vpop.f32.mrf.mxu0  ;;  %v1180_v34 = vpop.f32.mrf.mxu1 }
 0x1a9   : > { %861 = vst [vmem:[%s1630_s7 + $0x8] sm:$0xff] %v1168_v33  ;;  %869 = vst [vmem:[%s1630_s7 + $0x48] sm:$0xff] %v1180_v34 }
 0x1aa   : > { %v781_v35 = vpop.f32.mrf.mxu0  ;;  %v821_v36 = vpop.f32.mrf.mxu1 }
 0x1ab   : > { %860 = vst [vmem:[%s1630_s7] sm:$0xff] %v781_v35  ;;  %868 = vst [vmem:[%s1630_s7 + $0x40] sm:$0xff] %v821_v36 }
 0x1ac   : > { %v1171_v37 = vpop.f32.mrf.mxu0  ;;  %v1183_v38 = vpop.f32.mrf.mxu1 }
 0x1ad   : > { %863 = vst [vmem:[%s1630_s7 + $0x18] sm:$0xff] %v1171_v37  ;;  %871 = vst [vmem:[%s1630_s7 + $0x58] sm:$0xff] %v1183_v38 }
 0x1ae   : > { %v791_v39 = vpop.f32.mrf.mxu0  ;;  %v831_v40 = vpop.f32.mrf.mxu1 }
 0x1af   : > { %862 = vst [vmem:[%s1630_s7 + $0x10] sm:$0xff] %v791_v39  ;;  %870 = vst [vmem:[%s1630_s7 + $0x50] sm:$0xff] %v831_v40 }
 0x1b0   : > { %v1174_v41 = vpop.f32.mrf.mxu0  ;;  %v1186_v42 = vpop.f32.mrf.mxu1  ;;  %v948_v50 = vld [vmem:[%s1630_s7 + $0x8] sm:$0xff] (%p1463_p9) }
 0x1b1   : > { %865 = vst [vmem:[%s1630_s7 + $0x28] sm:$0xff] %v1174_v41  ;;  %873 = vst [vmem:[%s1630_s7 + $0x68] sm:$0xff] %v1186_v42  ;;  %v964_v58 = vld [vmem:[%s1630_s7 + $0x48] sm:$0xff] (%p1463_p9) }
 0x1b2   : > { %v801_v43 = vpop.f32.mrf.mxu0  ;;  %v841_v44 = vpop.f32.mrf.mxu1  ;;  %v946_v49 = vld [vmem:[%s1630_s7] sm:$0xff] (%p1463_p9)  ;;  %949 = vst [vmem:[%s887_s14 + $0x10] sm:$0xff] (%p1463_p9), %v948_v50  ;;  %965 = vst [vmem:[%s887_s14 + $0x90] sm:$0xff] (%p1463_p9), %v964_v58 }
 0x1b3   : > { %864 = vst [vmem:[%s1630_s7 + $0x20] sm:$0xff] %v801_v43  ;;  %872 = vst [vmem:[%s1630_s7 + $0x60] sm:$0xff] %v841_v44  ;;  %882 = sbr.rel (!%p1463_p9) target bundleno = 449 (0x1c1), region = 120  ;;  %v962_v57 = vld [vmem:[%s1630_s7 + $0x40] sm:$0xff] (%p1463_p9) }
 0x1b4   : > { %v1177_v45 = vpop.f32.mrf.mxu0  ;;  %v1189_v46 = vpop.f32.mrf.mxu1  ;;  %v952_v52 = vld [vmem:[%s1630_s7 + $0x18] sm:$0xff] (%p1463_p9)  ;;  %947 = vst [vmem:[%s887_s14] sm:$0xff] (%p1463_p9), %v946_v49  ;;  %963 = vst [vmem:[%s887_s14 + $0x80] sm:$0xff] (%p1463_p9), %v962_v57 }
 0x1b5   : > { %867 = vst [vmem:[%s1630_s7 + $0x38] sm:$0xff] %v1177_v45  ;;  %875 = vst [vmem:[%s1630_s7 + $0x78] sm:$0xff] %v1189_v46  ;;  %v968_v60 = vld [vmem:[%s1630_s7 + $0x58] sm:$0xff] (%p1463_p9) }
 0x1b6   : > { %v811_v47 = vpop.f32.mrf.mxu0  ;;  %v851_v48 = vpop.f32.mrf.mxu1  ;;  %v950_v51 = vld [vmem:[%s1630_s7 + $0x10] sm:$0xff] (%p1463_p9)  ;;  %953 = vst [vmem:[%s887_s14 + $0x30] sm:$0xff] (%p1463_p9), %v952_v52  ;;  %969 = vst [vmem:[%s887_s14 + $0xb0] sm:$0xff] (%p1463_p9), %v968_v60 }
 0x1b7   : > { %866 = vst [vmem:[%s1630_s7 + $0x30] sm:$0xff] %v811_v47  ;;  %874 = vst [vmem:[%s1630_s7 + $0x70] sm:$0xff] %v851_v48  ;;  %v966_v59 = vld [vmem:[%s1630_s7 + $0x50] sm:$0xff] (%p1463_p9) }
 0x1b8   : > { %v956_v54 = vld [vmem:[%s1630_s7 + $0x28] sm:$0xff]  ;;  %951 = vst [vmem:[%s887_s14 + $0x20] sm:$0xff] %v950_v51  ;;  %967 = vst [vmem:[%s887_s14 + $0xa0] sm:$0xff] %v966_v59 }
 0x1b9   : > { %957 = vst [vmem:[%s887_s14 + $0x50] sm:$0xff] %v956_v54  ;;  %v972_v62 = vld [vmem:[%s1630_s7 + $0x68] sm:$0xff] }
 0x1ba   : > { %v954_v53 = vld [vmem:[%s1630_s7 + $0x20] sm:$0xff]  ;;  %973 = vst [vmem:[%s887_s14 + $0xd0] sm:$0xff] %v972_v62 }
 0x1bb   : > { %955 = vst [vmem:[%s887_s14 + $0x40] sm:$0xff] %v954_v53  ;;  %v970_v61 = vld [vmem:[%s1630_s7 + $0x60] sm:$0xff] }
 0x1bc   : > { %v960_v56 = vld [vmem:[%s1630_s7 + $0x38] sm:$0xff]  ;;  %971 = vst [vmem:[%s887_s14 + $0xc0] sm:$0xff] %v970_v61 }
 0x1bd   : > { %961 = vst [vmem:[%s887_s14 + $0x70] sm:$0xff] %v960_v56  ;;  %v976_v0 = vld [vmem:[%s1630_s7 + $0x78] sm:$0xff] }
 0x1be   : > { %v958_v55 = vld [vmem:[%s1630_s7 + $0x30] sm:$0xff]  ;;  %977 = vst [vmem:[%s887_s14 + $0xf0] sm:$0xff] %v976_v0 }
 0x1bf   : > { %959 = vst [vmem:[%s887_s14 + $0x60] sm:$0xff] %v958_v55  ;;  %v974_v63 = vld [vmem:[%s1630_s7 + $0x70] sm:$0xff] }
 0x1c0   : > { %975 = vst [vmem:[%s887_s14 + $0xe0] sm:$0xff] %v974_v63 }
 0x1c1 PF: > { %s15_s26 = sadd.s32 1, %s1362_s26   ;;  %s1706_s18 = smov %s1334_s19 }
 0x1c2   : > { %p12_p1 = scmp.ge.s32.totalorder %s15_s26, 6   ;;  %s1707_s19 = smov %s1471_s13 }
 0x1c3   : > { %s1708_s20 = smov %s1342_s21  ;;  %s1709_s21 = smov %s1468_s12 }
 0x1c4   : > { %s1710_s22 = smov %s1354_s24  ;;  %s1711_s23 = smov %s1358_s25 }
 0x1c5   : > { %s1712_s24 = smov %s1715_s27  ;;  %s1713_s25 = smov %s1719_s28 }
 0x1c6   :  { %14 = sbr.rel (!%p12_p1) target bundleno = 5 (0x5), region = 200 }

</bundles_post_ra>
